<compile_context>
chip_gen: v6e
topology: v6e:2x2x1
jax: 0.10.0
libtpu: 0.0.40
codegen_flags: <defaults>
</compile_context>

<pallas_src>
import math

import jax
import jax.numpy as jnp
from jax import lax
from jax.experimental import pallas as pl
from jax.experimental.pallas import tpu as pltpu


def _make_attention_kernel(n_head: int, scale: bool, compute_dtype):
    def kernel(x_ref, w_attn_ref, b_attn_ref, w_proj_ref, b_proj_ref, o_ref,
               a_scratch):
        T, nx = x_ref.shape
        hd = nx // n_head

        # ---- c_attn: torch.addmm(b, x, w); bf16 operands, f32 MXU accumulate ----
        x_c = x_ref[...].astype(compute_dtype)
        qkv = jnp.dot(x_c, w_attn_ref[...],
                      preferred_element_type=jnp.float32)
        qkv = qkv + b_attn_ref[...]                       # (T, 3*nx) f32

        q = qkv[:, 0 * nx:1 * nx]
        if scale:
            # Fold 1/sqrt(hd) into q (T*nx multiplies, once) instead of
            # dividing every (T, T) score matrix per head.
            q = q * jnp.float32(1.0 / math.sqrt(hd))
        q = q.astype(compute_dtype)
        k = qkv[:, 1 * nx:2 * nx].astype(compute_dtype)
        v = qkv[:, 2 * nx:3 * nx].astype(compute_dtype)

        # Causal mask (assumes T == n_ctx, exactly like the PyTorch buffer use).
        # Built once, reused by every head, applied with a single select.
        row = lax.broadcasted_iota(jnp.int32, (T, T), 0)
        col = lax.broadcasted_iota(jnp.int32, (T, T), 1)
        causal = row >= col

        # Static per-head loop. Each head's (T, hd) result is stored directly
        # into its lane slice of the scratch slab, so only one head result is
        # live at a time and merge_heads is free (no concatenate relayout).
        # TODO(synk): for realistic shapes (T >= 512, hd = 64) batch the heads
        # into one 3-D dot_general and tile the query axis with an online-
        # softmax (flash) inner loop so the working set stays inside v7x's
        # 64 MiB VMEM and the MXU sees >= 128-wide contractions.
        for h in range(n_head):
            qh = q[:, h * hd:(h + 1) * hd]                 # (T, hd)
            kh = k[:, h * hd:(h + 1) * hd]
            vh = v[:, h * hd:(h + 1) * hd]

            # q @ k^T, contraction over the head dim, no explicit transpose.
            s = lax.dot_general(qh, kh, (((1,), (1,)), ((), ())),
                                preferred_element_type=jnp.float32)  # (T, T)

            # Same semantics as w*b + (-1e9)*(1-b), one VALU select per element.
            s = jnp.where(causal, s, jnp.float32(-1e9))

            # Softmax over the last dim; reciprocal goes to the EUP slot.
            s = s - jnp.max(s, axis=-1, keepdims=True)
            e = jnp.exp(s)
            denom = jnp.sum(e, axis=-1, keepdims=True)
            p = e * pl.reciprocal(denom, approx=True)

            ah = jnp.dot(p.astype(compute_dtype), vh,
                         preferred_element_type=jnp.float32)         # (T, hd)
            a_scratch[:, h * hd:(h + 1) * hd] = ah.astype(a_scratch.dtype)

        # ---- c_proj; single lane-dense (T, nx) store ----
        out = jnp.dot(a_scratch[...], w_proj_ref[...],
                      preferred_element_type=jnp.float32)
        out = out + b_proj_ref[...]                        # (T, nx)
        o_ref[...] = out.astype(o_ref.dtype)

    return kernel


def attention_v2_pallas(x, w_attn, b_attn, w_proj, b_proj, *, n_head,
                        scale=False, compute_dtype=jnp.bfloat16):
    B, T, nx = x.shape
    assert nx % n_head == 0
    hd = nx // n_head

    # Cast weights to the compute dtype in the wrapper: halves their VMEM
    # footprint and HBM->VMEM traffic; MXU still accumulates in f32.
    w_attn_c = w_attn.astype(compute_dtype)
    w_proj_c = w_proj.astype(compute_dtype)
    b_attn_2d = b_attn.reshape(1, 3 * nx).astype(jnp.float32)
    b_proj_2d = b_proj.reshape(1, nx).astype(jnp.float32)

    kernel = _make_attention_kernel(n_head, scale, compute_dtype)

    # Advisory cost estimate so XLA can schedule around the custom call.
    flops = B * (2 * T * nx * (3 * nx)                 # c_attn
                 + n_head * 2 * (2 * T * T * hd)       # QK^T + PV
                 + 2 * T * nx * nx)                    # c_proj
    transcendentals = B * n_head * T * T               # exp in softmax
    bytes_accessed = (2 * B * T * nx * x.dtype.itemsize
                      + w_attn_c.size * w_attn_c.dtype.itemsize
                      + w_proj_c.size * w_proj_c.dtype.itemsize
                      + b_attn_2d.size * 4 + b_proj_2d.size * 4)

    return pl.pallas_call(
        kernel,
        out_shape=jax.ShapeDtypeStruct((B, T, nx), x.dtype),
        grid_spec=pltpu.PrefetchScalarGridSpec(
            num_scalar_prefetch=0,
            grid=(B,),
            in_specs=[
                # Leading batch dim squeezed out of the kernel view.
                pl.BlockSpec((None, T, nx), lambda b: (b, 0, 0)),     # x
                # Constant index_map -> Pallas skips re-fetching these blocks
                # across batch grid steps.
                pl.BlockSpec((nx, 3 * nx), lambda b: (0, 0)),         # w_attn
                pl.BlockSpec((1, 3 * nx), lambda b: (0, 0)),          # b_attn
                pl.BlockSpec((nx, nx), lambda b: (0, 0)),             # w_proj
                pl.BlockSpec((1, nx), lambda b: (0, 0)),              # b_proj
            ],
            out_specs=pl.BlockSpec((None, T, nx), lambda b: (b, 0, 0)),
            scratch_shapes=[pltpu.VMEM((T, nx), compute_dtype)],      # merged heads
        ),
        compiler_params=pltpu.CompilerParams(
            # Batch elements are independent: lets v7x shard the grid over its
            # two TensorCores; neutral on single-TC v5e/v6e.
            dimension_semantics=("parallel",),
            # Default scoped VMEM (32 MiB) is hit long before physical VMEM;
            # raise it so the monolithic per-batch tile survives larger T*nx.
            vmem_limit_bytes=64 * 1024 * 1024,
        ),
        cost_estimate=pl.CostEstimate(
            flops=flops,
            transcendentals=transcendentals,
            bytes_accessed=bytes_accessed),
    )(x, w_attn_c, b_attn_2d, w_proj_c, b_proj_2d)


def attention_v2_ref(x, w_attn, b_attn, w_proj, b_proj, *, n_head, scale=False):
    """Pure-JAX f32 reference mirroring the PyTorch forward exactly."""
    B, T, nx = x.shape
    hd = nx // n_head
    qkv = x @ w_attn + b_attn                              # (B, T, 3*nx)
    q, k, v = jnp.split(qkv, 3, axis=-1)

    def split_heads(t):
        return t.reshape(B, T, n_head, hd).transpose(0, 2, 1, 3)  # (B, H, T, hd)

    q, k, v = split_heads(q), split_heads(k), split_heads(v)
    w = jnp.einsum("bhqd,bhkd->bhqk", q, k)
    if scale:
        w = w / math.sqrt(hd)
    mask = jnp.tril(jnp.ones((T, T), jnp.float32))[None, None]
    w = w * mask + (-1e9) * (1.0 - mask)
    w = jax.nn.softmax(w, axis=-1)
    a = jnp.einsum("bhqk,bhkd->bhqd", w, v)
    a = a.transpose(0, 2, 1, 3).reshape(B, T, nx)
    return a @ w_proj + b_proj


if __name__ == "__main__":
    # Small, module-consistent shapes: nx=32, n_ctx=T=8, n_head=4, batch=2.
    B, T, NX, N_HEAD = 2, 8, 32, 4
    SCALE = True

    key = jax.random.PRNGKey(0)
    kx, kw1, kw2 = jax.random.split(key, 3)

    x = jax.random.normal(kx, (B, T, NX), dtype=jnp.float32)

    # Conv1D(nf=3*nx, rf=1, nx): w ~ N(0, 0.02), b = 0
    w_attn = 0.02 * jax.random.normal(kw1, (NX, 3 * NX), dtype=jnp.float32)
    b_attn = jnp.zeros((3 * NX,), dtype=jnp.float32)
    # Conv1D(nf=nx, rf=1, nx)
    w_proj = 0.02 * jax.random.normal(kw2, (NX, NX), dtype=jnp.float32)
    b_proj = jnp.zeros((NX,), dtype=jnp.float32)

    ref = attention_v2_ref(x, w_attn, b_attn, w_proj, b_proj,
                           n_head=N_HEAD, scale=SCALE)
    ref = jax.block_until_ready(ref)

    # f32 compute path: numerically faithful to the module.
    out_f32 = attention_v2_pallas(x, w_attn, b_attn, w_proj, b_proj,
                                  n_head=N_HEAD, scale=SCALE,
                                  compute_dtype=jnp.float32)
    out_f32 = jax.block_until_ready(out_f32)
    assert out_f32.shape == (B, T, NX)
    assert jnp.allclose(out_f32, ref, atol=1e-4, rtol=1e-4), (
        float(jnp.max(jnp.abs(out_f32 - ref))))

    # bf16 matmul operands (default, MXU-optimized) with f32 accumulation.
    out_bf16 = attention_v2_pallas(x, w_attn, b_attn, w_proj, b_proj,
                                   n_head=N_HEAD, scale=SCALE,
                                   compute_dtype=jnp.bfloat16)
    out_bf16 = jax.block_until_ready(out_bf16)
    assert out_bf16.shape == (B, T, NX)
    assert jnp.allclose(out_bf16, ref, atol=2e-3, rtol=2e-2), (
        float(jnp.max(jnp.abs(out_bf16 - ref))))

    print("KERNEL_OK")
</pallas_src>

<mosaic_0001>
module attributes {stable_mosaic.version = 11 : i64} {
  func.func @kernel(%arg0: i32, %arg1: memref<1x8x32xf32, #tpu.memory_space<vmem>>, %arg2: memref<32x96xf32, #tpu.memory_space<vmem>>, %arg3: memref<1x96xf32, #tpu.memory_space<vmem>>, %arg4: memref<32x32xf32, #tpu.memory_space<vmem>>, %arg5: memref<1x32xf32, #tpu.memory_space<vmem>>, %arg6: memref<1x8x32xf32, #tpu.memory_space<vmem>>, %arg7: memref<8x32xf32, #tpu.memory_space<vmem>>) attributes {dimension_semantics = [#tpu.dimension_semantics<parallel>], iteration_bounds = array<i64: 2>, scalar_prefetch = 0 : i64, scratch_operands = 1 : i64, tpu.core_type = #tpu.core_type<tc>, window_params = [{transform_indices = @transform_0, window_bounds = array<i64: 1, 8, 32>}, {pipeline_mode = #tpu.pipeline_mode<synchronous>, transform_indices = @transform_1, window_bounds = array<i64: 32, 96>}, {pipeline_mode = #tpu.pipeline_mode<synchronous>, transform_indices = @transform_2, window_bounds = array<i64: 1, 96>}, {pipeline_mode = #tpu.pipeline_mode<synchronous>, transform_indices = @transform_3, window_bounds = array<i64: 32, 32>}, {pipeline_mode = #tpu.pipeline_mode<synchronous>, transform_indices = @transform_4, window_bounds = array<i64: 1, 32>}, {transform_indices = @transform_5, window_bounds = array<i64: 1, 8, 32>}]} {
    %c0 = arith.constant 0 : index
    %c0_0 = arith.constant 0 : index
    %c0_1 = arith.constant 0 : index
    %0 = vector.load %arg1[%c0, %c0_0, %c0_1] : memref<1x8x32xf32, #tpu.memory_space<vmem>>, vector<1x8x32xf32>
    %1 = vector.shape_cast %0 : vector<1x8x32xf32> to vector<8x32xf32>
    %c0_2 = arith.constant 0 : index
    %c0_3 = arith.constant 0 : index
    %2 = vector.load %arg2[%c0_2, %c0_3] : memref<32x96xf32, #tpu.memory_space<vmem>>, vector<32x96xf32>
    %cst = arith.constant dense<0.000000e+00> : vector<8x96xf32>
    %3 = tpu.matmul %1, %2, %cst {dimension_numbers = #tpu.dot_dimension_numbers<[1], [0], [0], [1], [0, 0, 1, 1], [], []>} : vector<8x32xf32>, vector<32x96xf32>, vector<8x96xf32> -> vector<8x96xf32>
    %c0_4 = arith.constant 0 : index
    %c0_5 = arith.constant 0 : index
    %4 = vector.load %arg3[%c0_4, %c0_5] : memref<1x96xf32, #tpu.memory_space<vmem>>, vector<1x96xf32>
    %5 = vector.broadcast %4 : vector<1x96xf32> to vector<8x96xf32>
    %6 = arith.addf %3, %5 : vector<8x96xf32>
    %7 = vector.extract_strided_slice %6 {offsets = [0, 0], sizes = [8, 32], strides = [1, 1]} : vector<8x96xf32> to vector<8x32xf32>
    %cst_6 = arith.constant 0.353553385 : f32
    %8 = vector.broadcast %cst_6 : f32 to vector<8x32xf32>
    %9 = arith.mulf %7, %8 : vector<8x32xf32>
    %10 = vector.extract_strided_slice %6 {offsets = [0, 32], sizes = [8, 32], strides = [1, 1]} : vector<8x96xf32> to vector<8x32xf32>
    %11 = vector.extract_strided_slice %6 {offsets = [0, 64], sizes = [8, 32], strides = [1, 1]} : vector<8x96xf32> to vector<8x32xf32>
    %12 = tpu.iota {dimensions = array<i32: 0>} : vector<8x8xi32>
    %13 = tpu.iota {dimensions = array<i32: 1>} : vector<8x8xi32>
    %14 = arith.cmpi sge, %12, %13 : vector<8x8xi32>
    %15 = vector.extract_strided_slice %9 {offsets = [0, 0], sizes = [8, 8], strides = [1, 1]} : vector<8x32xf32> to vector<8x8xf32>
    %16 = vector.extract_strided_slice %10 {offsets = [0, 0], sizes = [8, 8], strides = [1, 1]} : vector<8x32xf32> to vector<8x8xf32>
    %17 = vector.extract_strided_slice %11 {offsets = [0, 0], sizes = [8, 8], strides = [1, 1]} : vector<8x32xf32> to vector<8x8xf32>
    %cst_7 = arith.constant dense<0.000000e+00> : vector<8x8xf32>
    %18 = tpu.matmul %15, %16, %cst_7 {dimension_numbers = #tpu.dot_dimension_numbers<[1], [1], [0], [0], [0, 0, 1, 0], [], []>} : vector<8x8xf32>, vector<8x8xf32>, vector<8x8xf32> -> vector<8x8xf32>
    %cst_8 = arith.constant -1.000000e+09 : f32
    %19 = vector.broadcast %cst_8 : f32 to vector<8x8xf32>
    %20 = arith.select %14, %18, %19 : vector<8x8xi1>, vector<8x8xf32>
    %cst_9 = arith.constant dense<0xFF800000> : vector<8xf32>
    %21 = vector.multi_reduction <maximumf>, %20, %cst_9 [1] : vector<8x8xf32> to vector<8xf32>
    %22 = vector.shape_cast %21 : vector<8xf32> to vector<8x1xf32>
    %23 = vector.broadcast %22 : vector<8x1xf32> to vector<8x8xf32>
    %24 = arith.subf %20, %23 : vector<8x8xf32>
    %25 = math.exp %24 : vector<8x8xf32>
    %cst_10 = arith.constant dense<0.000000e+00> : vector<8xf32>
    %26 = vector.multi_reduction <add>, %25, %cst_10 [1] : vector<8x8xf32> to vector<8xf32>
    %27 = vector.shape_cast %26 : vector<8xf32> to vector<8x1xf32>
    %28 = tpu.reciprocal %27 {approx = true} : vector<8x1xf32> -> vector<8x1xf32>
    %29 = vector.broadcast %28 : vector<8x1xf32> to vector<8x8xf32>
    %30 = arith.mulf %25, %29 : vector<8x8xf32>
    %cst_11 = arith.constant dense<0.000000e+00> : vector<8x8xf32>
    %31 = tpu.matmul %30, %17, %cst_11 {dimension_numbers = #tpu.dot_dimension_numbers<[1], [0], [0], [1], [0, 0, 1, 1], [], []>} : vector<8x8xf32>, vector<8x8xf32>, vector<8x8xf32> -> vector<8x8xf32>
    %c0_12 = arith.constant 0 : index
    %c0_13 = arith.constant 0 : index
    %32 = vector.load %arg7[%c0_12, %c0_13] : memref<8x32xf32, #tpu.memory_space<vmem>>, vector<8x8xf32>
    tpu.vector_store %arg7[%c0_12, %c0_13], %31 {strides = array<i32>} : memref<8x32xf32, #tpu.memory_space<vmem>>, vector<8x8xf32>,
    %33 = vector.extract_strided_slice %9 {offsets = [0, 8], sizes = [8, 8], strides = [1, 1]} : vector<8x32xf32> to vector<8x8xf32>
    %34 = vector.extract_strided_slice %10 {offsets = [0, 8], sizes = [8, 8], strides = [1, 1]} : vector<8x32xf32> to vector<8x8xf32>
    %35 = vector.extract_strided_slice %11 {offsets = [0, 8], sizes = [8, 8], strides = [1, 1]} : vector<8x32xf32> to vector<8x8xf32>
    %cst_14 = arith.constant dense<0.000000e+00> : vector<8x8xf32>
    %36 = tpu.matmul %33, %34, %cst_14 {dimension_numbers = #tpu.dot_dimension_numbers<[1], [1], [0], [0], [0, 0, 1, 0], [], []>} : vector<8x8xf32>, vector<8x8xf32>, vector<8x8xf32> -> vector<8x8xf32>
    %cst_15 = arith.constant -1.000000e+09 : f32
    %37 = vector.broadcast %cst_15 : f32 to vector<8x8xf32>
    %38 = arith.select %14, %36, %37 : vector<8x8xi1>, vector<8x8xf32>
    %cst_16 = arith.constant dense<0xFF800000> : vector<8xf32>
    %39 = vector.multi_reduction <maximumf>, %38, %cst_16 [1] : vector<8x8xf32> to vector<8xf32>
    %40 = vector.shape_cast %39 : vector<8xf32> to vector<8x1xf32>
    %41 = vector.broadcast %40 : vector<8x1xf32> to vector<8x8xf32>
    %42 = arith.subf %38, %41 : vector<8x8xf32>
    %43 = math.exp %42 : vector<8x8xf32>
    %cst_17 = arith.constant dense<0.000000e+00> : vector<8xf32>
    %44 = vector.multi_reduction <add>, %43, %cst_17 [1] : vector<8x8xf32> to vector<8xf32>
    %45 = vector.shape_cast %44 : vector<8xf32> to vector<8x1xf32>
    %46 = tpu.reciprocal %45 {approx = true} : vector<8x1xf32> -> vector<8x1xf32>
    %47 = vector.broadcast %46 : vector<8x1xf32> to vector<8x8xf32>
    %48 = arith.mulf %43, %47 : vector<8x8xf32>
    %cst_18 = arith.constant dense<0.000000e+00> : vector<8x8xf32>
    %49 = tpu.matmul %48, %35, %cst_18 {dimension_numbers = #tpu.dot_dimension_numbers<[1], [0], [0], [1], [0, 0, 1, 1], [], []>} : vector<8x8xf32>, vector<8x8xf32>, vector<8x8xf32> -> vector<8x8xf32>
    %c0_19 = arith.constant 0 : index
    %c8 = arith.constant 8 : index
    %50 = vector.load %arg7[%c0_19, %c8] : memref<8x32xf32, #tpu.memory_space<vmem>>, vector<8x8xf32>
    tpu.vector_store %arg7[%c0_19, %c8], %49 {strides = array<i32>} : memref<8x32xf32, #tpu.memory_space<vmem>>, vector<8x8xf32>,
    %51 = vector.extract_strided_slice %9 {offsets = [0, 16], sizes = [8, 8], strides = [1, 1]} : vector<8x32xf32> to vector<8x8xf32>
    %52 = vector.extract_strided_slice %10 {offsets = [0, 16], sizes = [8, 8], strides = [1, 1]} : vector<8x32xf32> to vector<8x8xf32>
    %53 = vector.extract_strided_slice %11 {offsets = [0, 16], sizes = [8, 8], strides = [1, 1]} : vector<8x32xf32> to vector<8x8xf32>
    %cst_20 = arith.constant dense<0.000000e+00> : vector<8x8xf32>
    %54 = tpu.matmul %51, %52, %cst_20 {dimension_numbers = #tpu.dot_dimension_numbers<[1], [1], [0], [0], [0, 0, 1, 0], [], []>} : vector<8x8xf32>, vector<8x8xf32>, vector<8x8xf32> -> vector<8x8xf32>
    %cst_21 = arith.constant -1.000000e+09 : f32
    %55 = vector.broadcast %cst_21 : f32 to vector<8x8xf32>
    %56 = arith.select %14, %54, %55 : vector<8x8xi1>, vector<8x8xf32>
    %cst_22 = arith.constant dense<0xFF800000> : vector<8xf32>
    %57 = vector.multi_reduction <maximumf>, %56, %cst_22 [1] : vector<8x8xf32> to vector<8xf32>
    %58 = vector.shape_cast %57 : vector<8xf32> to vector<8x1xf32>
    %59 = vector.broadcast %58 : vector<8x1xf32> to vector<8x8xf32>
    %60 = arith.subf %56, %59 : vector<8x8xf32>
    %61 = math.exp %60 : vector<8x8xf32>
    %cst_23 = arith.constant dense<0.000000e+00> : vector<8xf32>
    %62 = vector.multi_reduction <add>, %61, %cst_23 [1] : vector<8x8xf32> to vector<8xf32>
    %63 = vector.shape_cast %62 : vector<8xf32> to vector<8x1xf32>
    %64 = tpu.reciprocal %63 {approx = true} : vector<8x1xf32> -> vector<8x1xf32>
    %65 = vector.broadcast %64 : vector<8x1xf32> to vector<8x8xf32>
    %66 = arith.mulf %61, %65 : vector<8x8xf32>
    %cst_24 = arith.constant dense<0.000000e+00> : vector<8x8xf32>
    %67 = tpu.matmul %66, %53, %cst_24 {dimension_numbers = #tpu.dot_dimension_numbers<[1], [0], [0], [1], [0, 0, 1, 1], [], []>} : vector<8x8xf32>, vector<8x8xf32>, vector<8x8xf32> -> vector<8x8xf32>
    %c0_25 = arith.constant 0 : index
    %c16 = arith.constant 16 : index
    %68 = vector.load %arg7[%c0_25, %c16] : memref<8x32xf32, #tpu.memory_space<vmem>>, vector<8x8xf32>
    tpu.vector_store %arg7[%c0_25, %c16], %67 {strides = array<i32>} : memref<8x32xf32, #tpu.memory_space<vmem>>, vector<8x8xf32>,
    %69 = vector.extract_strided_slice %9 {offsets = [0, 24], sizes = [8, 8], strides = [1, 1]} : vector<8x32xf32> to vector<8x8xf32>
    %70 = vector.extract_strided_slice %10 {offsets = [0, 24], sizes = [8, 8], strides = [1, 1]} : vector<8x32xf32> to vector<8x8xf32>
    %71 = vector.extract_strided_slice %11 {offsets = [0, 24], sizes = [8, 8], strides = [1, 1]} : vector<8x32xf32> to vector<8x8xf32>
    %cst_26 = arith.constant dense<0.000000e+00> : vector<8x8xf32>
    %72 = tpu.matmul %69, %70, %cst_26 {dimension_numbers = #tpu.dot_dimension_numbers<[1], [1], [0], [0], [0, 0, 1, 0], [], []>} : vector<8x8xf32>, vector<8x8xf32>, vector<8x8xf32> -> vector<8x8xf32>
    %cst_27 = arith.constant -1.000000e+09 : f32
    %73 = vector.broadcast %cst_27 : f32 to vector<8x8xf32>
    %74 = arith.select %14, %72, %73 : vector<8x8xi1>, vector<8x8xf32>
    %cst_28 = arith.constant dense<0xFF800000> : vector<8xf32>
    %75 = vector.multi_reduction <maximumf>, %74, %cst_28 [1] : vector<8x8xf32> to vector<8xf32>
    %76 = vector.shape_cast %75 : vector<8xf32> to vector<8x1xf32>
    %77 = vector.broadcast %76 : vector<8x1xf32> to vector<8x8xf32>
    %78 = arith.subf %74, %77 : vector<8x8xf32>
    %79 = math.exp %78 : vector<8x8xf32>
    %cst_29 = arith.constant dense<0.000000e+00> : vector<8xf32>
    %80 = vector.multi_reduction <add>, %79, %cst_29 [1] : vector<8x8xf32> to vector<8xf32>
    %81 = vector.shape_cast %80 : vector<8xf32> to vector<8x1xf32>
    %82 = tpu.reciprocal %81 {approx = true} : vector<8x1xf32> -> vector<8x1xf32>
    %83 = vector.broadcast %82 : vector<8x1xf32> to vector<8x8xf32>
    %84 = arith.mulf %79, %83 : vector<8x8xf32>
    %cst_30 = arith.constant dense<0.000000e+00> : vector<8x8xf32>
    %85 = tpu.matmul %84, %71, %cst_30 {dimension_numbers = #tpu.dot_dimension_numbers<[1], [0], [0], [1], [0, 0, 1, 1], [], []>} : vector<8x8xf32>, vector<8x8xf32>, vector<8x8xf32> -> vector<8x8xf32>
    %c0_31 = arith.constant 0 : index
    %c24 = arith.constant 24 : index
    %86 = vector.load %arg7[%c0_31, %c24] : memref<8x32xf32, #tpu.memory_space<vmem>>, vector<8x8xf32>
    tpu.vector_store %arg7[%c0_31, %c24], %85 {strides = array<i32>} : memref<8x32xf32, #tpu.memory_space<vmem>>, vector<8x8xf32>,
    %c0_32 = arith.constant 0 : index
    %c0_33 = arith.constant 0 : index
    %87 = vector.load %arg7[%c0_32, %c0_33] : memref<8x32xf32, #tpu.memory_space<vmem>>, vector<8x32xf32>
    %c0_34 = arith.constant 0 : index
    %c0_35 = arith.constant 0 : index
    %88 = vector.load %arg4[%c0_34, %c0_35] : memref<32x32xf32, #tpu.memory_space<vmem>>, vector<32x32xf32>
    %cst_36 = arith.constant dense<0.000000e+00> : vector<8x32xf32>
    %89 = tpu.matmul %87, %88, %cst_36 {dimension_numbers = #tpu.dot_dimension_numbers<[1], [0], [0], [1], [0, 0, 1, 1], [], []>} : vector<8x32xf32>, vector<32x32xf32>, vector<8x32xf32> -> vector<8x32xf32>
    %c0_37 = arith.constant 0 : index
    %c0_38 = arith.constant 0 : index
    %90 = vector.load %arg5[%c0_37, %c0_38] : memref<1x32xf32, #tpu.memory_space<vmem>>, vector<1x32xf32>
    %91 = vector.broadcast %90 : vector<1x32xf32> to vector<8x32xf32>
    %92 = arith.addf %89, %91 : vector<8x32xf32>
    %c0_39 = arith.constant 0 : index
    %c0_40 = arith.constant 0 : index
    %c0_41 = arith.constant 0 : index
    %93 = vector.load %arg6[%c0_39, %c0_40, %c0_41] : memref<1x8x32xf32, #tpu.memory_space<vmem>>, vector<1x8x32xf32>
    %94 = vector.shape_cast %93 : vector<1x8x32xf32> to vector<8x32xf32>
    %95 = vector.shape_cast %92 : vector<8x32xf32> to vector<1x8x32xf32>
    tpu.vector_store %arg6[%c0_39, %c0_40, %c0_41], %95 {strides = array<i32>} : memref<1x8x32xf32, #tpu.memory_space<vmem>>, vector<1x8x32xf32>,
    return
  }
  func.func @transform_0(%arg0: i32) -> (i32, i32, i32) {
    %c0_i32 = arith.constant 0 : i32
    %c0_i32_0 = arith.constant 0 : i32
    %c0_i32_1 = arith.constant 0 : i32
    return %arg0, %c0_i32, %c0_i32_0 : i32, i32, i32
  }
  func.func @transform_1(%arg0: i32) -> (i32, i32) {
    %c0_i32 = arith.constant 0 : i32
    %c0_i32_0 = arith.constant 0 : i32
    %c0_i32_1 = arith.constant 0 : i32
    return %c0_i32, %c0_i32_0 : i32, i32
  }
  func.func @transform_2(%arg0: i32) -> (i32, i32) {
    %c0_i32 = arith.constant 0 : i32
    %c0_i32_0 = arith.constant 0 : i32
    %c0_i32_1 = arith.constant 0 : i32
    return %c0_i32, %c0_i32_0 : i32, i32
  }
  func.func @transform_3(%arg0: i32) -> (i32, i32) {
    %c0_i32 = arith.constant 0 : i32
    %c0_i32_0 = arith.constant 0 : i32
    %c0_i32_1 = arith.constant 0 : i32
    return %c0_i32, %c0_i32_0 : i32, i32
  }
  func.func @transform_4(%arg0: i32) -> (i32, i32) {
    %c0_i32 = arith.constant 0 : i32
    %c0_i32_0 = arith.constant 0 : i32
    %c0_i32_1 = arith.constant 0 : i32
    return %c0_i32, %c0_i32_0 : i32, i32
  }
  func.func @transform_5(%arg0: i32) -> (i32, i32, i32) {
    %c0_i32 = arith.constant 0 : i32
    %c0_i32_0 = arith.constant 0 : i32
    %c0_i32_1 = arith.constant 0 : i32
    return %arg0, %c0_i32, %c0_i32_0 : i32, i32, i32
  }
}

</mosaic_0001>

<bundles_post_ra>
// kernel: tpu_custom_call.1
= control target key start
LH: loop header
LB: loop body
LE: loop exit
PB: predicated region body
PF: predicated region fallthrough
CT: control target
= control target key end

     0   :  { %10 = vsyncpa [#allocation4], 0  ;;  %s1913_s0 = inlined_call_operand.hbm [shape: f32[2,8,32], index: 0, kind: input, shape index: {}]   ;;  %s1914_s1 = inlined_call_operand.hbm [shape: f32[32,96], index: 1, kind: input, shape index: {}]   ;;  %s1915_s2 = inlined_call_operand.vmem [shape: f32[1,96], index: 2, kind: input, shape index: {}]   ;;  %s1916_s3 = inlined_call_operand.hbm [shape: f32[32,32], index: 3, kind: input, shape index: {}]   ;;  %s1917_s4 = inlined_call_operand.vmem [shape: f32[1,32], index: 4, kind: input, shape index: {}]   ;;  %s1918_s5 = inlined_call_operand.hbm [shape: f32[2,8,32], index: 5, kind: output, shape index: {}]  }
   0x1   :  { %12 = vsyncpa [#allocation4 + $0x1], 0 }
   0x2   :  { %13 = vsyncpa [#allocation7], 0 }
   0x3   :  { %14 = vsyncpa [#allocation5], 0 }
   0x4   :  { %16 = vsyncpa [#allocation5 + $0x1], 0  ;;  %s1657_s18 = smov 0   ;;  %s1659_s19 = smov 0  }
   0x5   :  { %s1661_s20 = smov 0   ;;  %s1663_s21 = smov 0  }
   0x6 LB: > { %s1678_s22 = sadd.s32 4294967295, %s1603_s21   ;;  %s1234_s23 = sadd.s32 4294967294, %s1603_s21   ;;  %s1603_s21 = sphi %s1663_s21, %s1940_s21   ;;  %s1599_s20 = sphi %s1661_s20, %s1939_s20   ;;  %s1595_s19 = sphi %s1659_s19, %s1938_s19   ;;  %s1591_s18 = sphi %s1657_s18, %s1937_s18  }
   0x7   : > { %p42_p0 = scmp.ne.s32.totalorder %s1595_s19, %s1591_s18  ;;  %p1919_p1 = scmp.eq.s32.totalorder %s1678_s22, 0 }
   0x8   : > { %p156_p3 = scmp.eq.s32.totalorder %s1234_s23, 1  ;;  %p1235_p5 = scmp.ge.s32.totalorder %s1603_s21, 1 }
   0x9   : > { %p1687_p4 = por %p1919_p1, %p42_p0  ;;  %p163_p7 = scmp.lt.s32.totalorder %s1603_s21, 3 }
   0xa   : > { %p1692_p6 = por %p156_p3, %p42_p0  ;;  %s1605_s27 = smov [#allocation6]  }
   0xb   : > { %s1923_s24 = scalar_select %p1687_p4, 1, 0 }
   0xc   : > { %s1924_s25 = scalar_select %p1692_p6, 1, 0 }
   0xd   : > { %p1697_p8 = pnand %p1235_p5, %p163_p7  ;;  %s175_s28 = sshll.u32 %s1605_s27, 4  ;;  %s176_s28 = int_to_ptr.vmem [resolvable:$true] %s175_s28 }
   0xe   : > { %s1606_s30 = smov [#allocation8]   ;;  %s1466_s7 = scalar_lea.vmem %s176_s28, 512 }
   0xf   : > { %s1925_s26 = scalar_select %p1697_p8, 1, 0 }
  0x10   : > { %p1366_p9 = pneg %p1697_p8  ;;  %s191_s6 = sshll.u32 %s1606_s30, 4  ;;  %s192_s6 = int_to_ptr.vmem [resolvable:$true] %s191_s6 }
  0x11   : > { %p1467_p13 = scmp.ne.s32.totalorder %s176_s28, %s1466_s7  ;;  %p1474_p5 = scmp.lt.s32.totalorder %s176_s28, %s176_s28 }
  0x12   : > { %p1706_p11 = pnand %p1366_p9, %p1919_p1  ;;  %p1475_p7 = scmp.lt.s32.totalorder %s1466_s7, %s1466_s7 }
  0x14   : > { %p1457_p12 = pneg %p1706_p11  ;;  %p1476_p10 = por %p1475_p7, %p1474_p5 }
  0x16   : > { %p1469_p0 = pnand %p1467_p13, %p1457_p12 }
  0x18   : > { %p1470_p3 = pneg %p1469_p0 }
  0x1a   : > { %p1477_p9 = pnand %p1476_p10, %p1470_p3 }
  0x1c   : > { %1480 = shalt.err (!%p1477_p9)
}
  0x1d   : > { %s1607_s8 = smov 128   ;;  %s1608_s9 = smov 8  }
  0x1e   : > { %1369 = dma.hbm_to_vmem [thread:$0]  (!%p1706_p11), %s1914_s1, 512, %s176_s28, [#allocation7], %s1607_s8, %s1607_s8, %s1608_s9  }
  0x1f   : > { %s1492_s12 = scalar_lea.vmem %s192_s6, 512  ;;  %p1500_p2 = scmp.lt.s32.totalorder %s192_s6, %s192_s6 }
  0x20   : > { %p1493_p1 = scmp.ne.s32.totalorder %s192_s6, %s1492_s12  ;;  %p1501_p6 = scmp.lt.s32.totalorder %s1492_s12, %s1492_s12 }
  0x22   : > { %p1495_p13 = pnand %p1493_p1, %p1457_p12  ;;  %p1502_p5 = por %p1501_p6, %p1500_p2 }
  0x24   : > { %p1496_p0 = pneg %p1495_p13 }
  0x26   : > { %p1503_p10 = pnand %p1502_p5, %p1496_p0 }
  0x28   : > { %1506 = shalt.err (!%p1503_p10)
}
  0x29   : > { %1372 = dma.hbm_to_vmem [thread:$0]  (!%p1706_p11), %s1916_s3, 512, %s192_s6, [#allocation7], %s1607_s8, %s1607_s8, %s1608_s9  }
  0x2a   : > { %s1729_s15 = sadd.s32 1, %s1603_s21   ;;  %s29_s16 = sadd.s32 1, %s1599_s20 }
  0x2b   : > { %s26_s17 = ssub.s32 %s1603_s21, %s1729_s15  ;;  %p36_p1 = scmp.ne.s32.totalorder %s1599_s20, %s1595_s19 }
  0x2c   : > { %p27_p2 = scmp.eq.s32.totalorder %s26_s17, 0  ;;  %p37_p6 = scmp.eq.s32.totalorder %s1603_s21, 0 }
  0x2d   : > { %p1927_p12 = scmp.eq.s32.totalorder %s1678_s22, 1  ;;  %p1383_p7 = scmp.lt.s32.totalorder %s1603_s21, 2 }
  0x2e   : > { %s1745_s27 = scalar_select %p27_p2, %s1599_s20, %s29_s16  }
  0x2f   : > { %p1739_p3 = por %p1927_p12, %p36_p1  ;;  %p38_p9 = por %p37_p6, %p36_p1 }
  0x30   : > { %s208_s28 = sand.u32 1, %s1599_s20   ;;  %s1240_s30 = sshll.u32 %s1603_s21, 7 }
  0x31   : > { %s1928_s23 = scalar_select %p1739_p3, 1, 0 }
  0x32   : > { %s1239_s29 = sshll.u32 %s208_s28, 3  ;;  %s1752_s8 = scalar_lea.hbm %s1913_s0, %s1240_s30 }
  0x33   : > { %s212_s9 = scalar_lea.vmem [#allocation3], %s1239_s29  ;;  %p1754_p11 = pnand %p1383_p7, %p38_p9 }
  0x34   : > { %s219_s10 = sshll.u32 %s212_s9, 4  ;;  %s209_s12 = scalar_lea.sflag [#allocation4], %s208_s28  ;;  %s220_s10 = int_to_ptr.vmem [resolvable:$true] %s219_s10 }
  0x35   : > { %s1507_s13 = scalar_lea.hbm %s1752_s8, 128  ;;  %p1509_p0 = pneg %p1754_p11 }
  0x36   : > { %p1508_p13 = scmp.ne.s32.totalorder %s1752_s8, %s1507_s13  ;;  %s1512_s17 = scalar_lea.hbm %s1913_s0, 256 }
  0x37   : > { %p1513_p1 = scmp.lt.s32.totalorder %s1752_s8, %s1913_s0  ;;  %p1514_p2 = scmp.lt.s32.totalorder %s1512_s17, %s1507_s13 }
  0x38   : > { %p1510_p5 = pnand %p1509_p0, %p1508_p13 }
  0x39   : > { %p1515_p6 = por %p1514_p2, %p1513_p1 }
  0x3a   : > { %p1511_p10 = pneg %p1510_p5 }
  0x3c   : > { %p1516_p12 = pnand %p1515_p6, %p1511_p10 }
  0x3e   : > { %1519 = shalt.err (!%p1516_p12)
}
  0x3f   : > { %s1520_s6 = scalar_lea.vmem %s220_s10, 128  ;;  %s1609_s28 = smov [#allocation3]  }
  0x40   : > { %p1521_p7 = scmp.ne.s32.totalorder %s220_s10, %s1520_s6  ;;  %s1525_s7 = sshll.u32 %s1609_s28, 4  ;;  %s1526_s7 = int_to_ptr.vmem [resolvable:$false] %s1525_s7 }
  0x41   : > { %s1527_s9 = scalar_lea.vmem %s1526_s7, 256  ;;  %p1528_p13 = scmp.lt.s32.totalorder %s220_s10, %s1526_s7 }
  0x42   : > { %p1523_p9 = pnand %p1521_p7, %p1509_p0  ;;  %p1529_p5 = scmp.lt.s32.totalorder %s1527_s9, %s1520_s6 }
  0x44   : > { %p1524_p3 = pneg %p1523_p9  ;;  %p1530_p4 = por %p1529_p5, %p1528_p13 }
  0x46   : > { %p1531_p8 = pnand %p1530_p4, %p1524_p3 }
  0x48   : > { %1534 = shalt.err (!%p1531_p8)
}
  0x49   : > { %1376 = dma.hbm_to_vmem [thread:$0]  (!%p1754_p11), %s1752_s8, 128, %s220_s10, %s209_s12  }
  0x4a   : > { %p1930_p10 = scmp.ne.s32.totalorder %s1925_s26, 0 }
  0x4b   : > { %s1775_s13 = sand.u32 (!%p1930_p10), 1, %s1595_s19   ;;  %p1931_p4 = scmp.ne.s32.totalorder (!%p1930_p10), %s1923_s24, 0 }
  0x4c   : > { %228 = sbr.rel (%p1930_p10) target bundleno = 1993 (0x7c9), region = 40  ;;  %s1242_s14 = sshll.u32 (!%p1930_p10), %s1775_s13, 3 }
  0x4d   : > { %s231_s16 = scalar_lea.sflag (!%p1930_p10), [#allocation4], %s1775_s13  ;;  %s234_s17 = scalar_lea.vmem (!%p1930_p10), [#allocation3], %s1242_s14 }
  0x51   : > { %1578 = dma.done.wait (%p1931_p4), %s231_s16, 128  }
  0x52   : > { %1580 = vsyncadd (%p1931_p4), %s231_s16, 4294967168  ;;  %p1932_p8 = scmp.eq.s32.totalorder %s1678_s22, 0 }
  0x54   : > { %1582 = dma.done.wait (%p1932_p8), [#allocation7], 1024   ;;  %p1933_p3 = pmov %p1932_p8 }
  0x55   : > { %v1610_v0 = vmov 0.0   ;;  %vm1611_vm0 = vmmov 0   ;;  %v273_v1 = vld [vmem:[#allocation6 + $0x18] sm:$0xff]  ;;  %v272_v2 = vld [vmem:[#allocation6 + $0x10] sm:$0xff]  ;;  %v271_v3 = vld [vmem:[#allocation6 + $0x8] sm:$0xff]  ;;  %vm281_vm1 = vcmask 261120   ;;  %v356_v16 = vlaneseq }
  0x56   : > { %1584 = vsyncadd (%p1933_p3), [#allocation7], 4294966272  ;;  %1292 = vmatprep.subr.mxu0 %v1610_v0  ;;  %1300 = vmatprep.mubr.msk.f32.mxu0 %vm1611_vm0, %v1610_v0  ;;  %v270_v4 = vld [vmem:[#allocation6] sm:$0xff]  ;;  %v269_v5 = vld [vmem:[%s234_s17] sm:$0xff]  ;;  %s1612_s8 = smov 64   ;;  %s1613_s10 = smov 96  }
  0x57   : > { %1303 = vmatprep.subr.mxu1 %v1610_v0  ;;  %1305 = vmatprep.mubr.msk.f32.mxu1 %vm1611_vm0, %v1610_v0  ;;  %v1246_v6 = vld [vmem:[%s1915_s2] ss:$0 sm:$0xff]  ;;  %s1614_s11 = smov 88   ;;  %s1615_s12 = smov 120   ;;  %vm364_vm2 = vcmask 64512   ;;  %v357_v17 = vshrl.u32 %v356_v16, 7 }
  0x58   : > { %1293 = vmatpush3.msra.mxu0 %v273_v1  ;;  %s1616_s30 = smov 80   ;;  %v359_v18 = vand.u32 127, %v356_v16  ;;  %s1617_s29 = smov 72   ;;  %v1046_v16 = vld [vmem:[#allocation8] sm:$0xff]  ;;  %vm699_vm4 = vcmask 130112   ;;  %vm871_vm5 = vcmask 195712  }
  0x59   : > { %1294 = vmatprep.subr.mxu0 %v1610_v0  ;;  %s1618_s6 = smov 112   ;;  %s1619_s28 = smov 104   ;;  %vm1043_vm6 = vcmask 261312  }
  0x5a   : > { %1295 = vmatpush3.msra.mxu0 %v272_v2  ;;  %vm360_vm3 = vcmp.ge.s32.totalorder %v357_v17, %v359_v18  ;;  %s1620_s7 = smov 56   ;;  %s1621_s9 = smov 48  }
  0x5b   : > { %1296 = vmatprep.subr.mxu0 %v1610_v0  ;;  %s1622_s16 = smov 40   ;;  %s1623_s17 = smov 8  }
  0x5c   : > { %1297 = vmatpush3.msra.mxu0 %v271_v3  ;;  %s1624_s24 = smov 16   ;;  %s1625_s26 = smov 24  }
  0x5d   : > { %1298 = vmatprep.subr.mxu0 %v1610_v0  ;;  %p1934_p0 = scmp.ne.s32.totalorder %s1928_s23, 0 }
  0x5e   : > { %1299 = vmatpush3.msra.mxu0 %v270_v4 }
  0x5f   : > { %1301 = vmatmul.mubr.msk.f32.vlgmr.msra.gmra.mxu0 %vm281_vm1, %v269_v5  ;;  %1323 = vmatprep.subr.mxu0 %v1610_v0 }
  0x60   : > { %1325 = vmatprep.mubr.msk.f32.mxu0 %vm1611_vm0, %v1610_v0 }
 0x11f   : > { %v351_v7 = vpop.f32.mrf.mxu0 }
 0x120   : > { %v1805_v8 = vadd.f32 %v1246_v6, %v351_v7 }
 0x121   : > { %v1302_v9 = vpop.f32.mrf.mxu0 }
 0x122   : > { %452 = vrot.lane.b32.xlu1 %v1805_v8, %s1612_s8  ;;  %362 = vrot.lane.b32.xlu0 %v1805_v8, %s1613_s10  ;;  %v355_v10 = vmul.f32 0.35355338, %v1805_v8 }
 0x126   : > { %531 = vrot.lane.b32.xlu1 %v1805_v8, %s1614_s11  ;;  %s1263_s11 = sshll.u32 %s1678_s22, 7  ;;  %s1626_s22 = smov [#allocation9]  }
 0x12a   : > { %529 = vrot.lane.b32.xlu1 %v355_v10, %s1615_s12  ;;  %s268_s12 = scalar_lea.vmem [#allocation9], %s1242_s14  ;;  %s1539_s14 = sshll.u32 %s1626_s22, 4  ;;  %s1540_s14 = int_to_ptr.vmem [resolvable:$false] %s1539_s14 }
 0x12e   : > { %703 = vrot.lane.b32.xlu1 %v1805_v8, %s1616_s30  ;;  %s1145_s30 = sshll.u32 %s268_s12, 4  ;;  %s1146_s30 = int_to_ptr.vmem [resolvable:$true] %s1145_s30 }
 0x12f   : > { %p1542_p6 = scmp.lt.s32.totalorder %s1146_s30, %s1540_s14 }
 0x194   : > { %v453_v11 = vpop.permute.xlu1 %452  ;;  %v363_v12 = vpop.permute.xlu0 %362 }
 0x195   : > { %1304 = vmatpush3.xpose.msk.msra.mxu1 %vm364_vm2, %v363_v12  ;;  %v1049_v12 = vld [vmem:[#allocation8 + $0x18] sm:$0xff] }
 0x196   : > { %1308 = vmatprep.subr.mxu1 %v1610_v0 }
 0x198   : > { %v532_v13 = vpop.permute.xlu1 %531  ;;  %1306 = vmatmul.mubr.msk.f32.vlgmr.msra.gmra.mxu1 %vm364_vm2, %v355_v10 }
 0x199   : > { %1309 = vmatpush3.msra.mxu1 %v453_v11  ;;  %1310 = vmatprep.mubr.msk.f32.mxu1 %vm1611_vm0, %v1610_v0 }
 0x19a   : > { %1313 = vmatprep.subr.mxu1 %v1610_v0 }
 0x19c   : > { %v530_v14 = vpop.permute.xlu1 %529 }
 0x1a0   : > { %v704_v15 = vpop.permute.xlu1 %703 }
 0x1a1   : > { %1324 = vmatpush3.xpose.msk.msra.mxu0 %vm364_vm2, %v704_v15 }
 0x1a2   : > { %1333 = vmatprep.subr.mxu0 %v1610_v0 }
 0x258   : > { %v436_v19 = vpop.f32.mrf.mxu1 }
 0x259   : > { %v440_v20 = vsel %vm360_vm3, %v436_v19, -1e+09 }
 0x25a   : > { %v1307_v21 = vpop.f32.mrf.mxu1  ;;  %v441_v22 = vsel %vm364_vm2, %v440_v20, -inf }
 0x25b   : > { %442 = vmax.xlane.f32.xlu0 %v441_v22 }
 0x271   : > { %875 = vrot.lane.b32.xlu0 %v1805_v8, %s1617_s29 }
 0x2e4   : > { %v443_v23 = vpop.xlane.xlu0 %442 }
 0x2e5   : > { %v444_v24 = vsub.f32 %v440_v20, %v443_v23 }
 0x2e7   : > { %v445_v25 = vmul.f32 1.442695, %v444_v24 }
 0x2e8   : > { %v876_v30 = vpop.permute.xlu0 %875 }
 0x2e9   : > { %1439 = vpow2.f32 %v445_v25  ;;  %v1260_v25 = vld [vmem:[%s1917_s4] ss:$0 sm:$0xff] }
 0x2f6   : > { %v1440_v26 = vpop.eup %1439 }
 0x2f7   : > { %v447_v27 = vsel %vm364_vm2, %v1440_v26, 0.0 }
 0x2f8   : > { %448 = vadd.xlane.f32.xlu1 %v447_v27 }
 0x309   : > { %701 = vrot.lane.b32.xlu1 %v355_v10, %s1618_s6 }
 0x30d   : > { %873 = vrot.lane.b32.xlu1 %v355_v10, %s1619_s28  ;;  %s1875_s28 = scalar_lea.hbm %s1918_s5, %s1263_s11 }
 0x381   : > { %v449_v28 = vpop.xlane.xlu1 %448 }
 0x382   : > { %1441 = vrcp.f32 %v449_v28 }
 0x385   : > { %v702_v29 = vpop.permute.xlu1 %701 }
 0x386   : > { %1326 = vmatmul.mubr.msk.f32.vlgmr.msra.gmra.mxu0 %vm364_vm2, %v702_v29 }
 0x387   : > { %1334 = vmatpush3.xpose.msk.msra.mxu0 %vm364_vm2, %v876_v30  ;;  %1335 = vmatprep.mubr.msk.f32.mxu0 %vm1611_vm0, %v1610_v0 }
 0x388   : > { %1343 = vmatprep.subr.mxu0 %v1610_v0 }
 0x389   : > { %v874_v31 = vpop.permute.xlu1 %873 }
 0x38a   : > { %1336 = vmatmul.mubr.msk.f32.vlgmr.msra.gmra.mxu0 %vm364_vm2, %v874_v31 }
 0x38b   : > { %1351 = vmatprep.mubr.msk.f32.mxu0 %vm1611_vm0, %v1610_v0  ;;  %1344 = vmatpush3.msra.mxu0 %v1049_v12 }
 0x38c   : > { %1345 = vmatprep.subr.mxu0 %v1610_v0 }
 0x38f   : > { %v1442_v32 = vpop.eup %1441 }
 0x390   : > { %v451_v33 = vmul.f32 %v1442_v32, %v1440_v26 }
 0x392   : > { %1311 = vmatmul.mubr.msk.f32.vlgmr.msra.gmra.mxu1 %vm364_vm2, %v451_v33 }
 0x393   : > { %1314 = vmatpush3.xpose.msk.msra.mxu1 %vm364_vm2, %v532_v13  ;;  %1315 = vmatprep.mubr.msk.f32.mxu1 %vm1611_vm0, %v1610_v0  ;;  %v1048_v13 = vld [vmem:[#allocation8 + $0x10] sm:$0xff] }
 0x394   : > { %1318 = vmatprep.subr.mxu1 %v1610_v0  ;;  %1346 = vmatpush3.msra.mxu0 %v1048_v13 }
 0x395   : > { %1347 = vmatprep.subr.mxu0 %v1610_v0 }
 0x396   : > { %1316 = vmatmul.mubr.msk.f32.vlgmr.msra.gmra.mxu1 %vm364_vm2, %v530_v14  ;;  %v1047_v14 = vld [vmem:[#allocation8 + $0x8] sm:$0xff] }
 0x397   : > { %1320 = vmatprep.mubr.msk.f32.mxu1 %vm1611_vm0, %v1610_v0  ;;  %1348 = vmatpush3.msra.mxu0 %v1047_v14 }
 0x398   : > { %1349 = vmatprep.subr.mxu0 %v1610_v0 }
 0x399   : > { %1350 = vmatpush3.msra.mxu0 %v1046_v16 }
 0x446   : > { %v775_v34 = vpop.f32.mrf.mxu0 }
 0x447   : > { %v779_v35 = vsel %vm360_vm3, %v775_v34, -1e+09 }
 0x448   : > { %v1327_v36 = vpop.f32.mrf.mxu0  ;;  %v780_v37 = vsel %vm364_vm2, %v779_v35, -inf }
 0x449   : > { %781 = vmax.xlane.f32.xlu0 %v780_v37 }
 0x44a   : > { %v947_v38 = vpop.f32.mrf.mxu0 }
 0x44b   : > { %v951_v46 = vsel %vm360_vm3, %v947_v38, -1e+09 }
 0x44c   : > { %v1337_v39 = vpop.f32.mrf.mxu0  ;;  %v952_v47 = vsel %vm364_vm2, %v951_v46, -inf }
 0x452   : > { %v524_v40 = vpop.f32.mrf.mxu1 }
 0x453   : > { %528 = vst.msk [vmem:[#allocation2] sm:$0xff] %vm364_vm2, %v524_v40 }
 0x454   : > { %v1312_v41 = vpop.f32.mrf.mxu1 }
 0x456   : > { %v603_v42 = vpop.f32.mrf.mxu1 }
 0x457   : > { %v607_v43 = vsel %vm360_vm3, %v603_v42, -1e+09 }
 0x458   : > { %v1317_v44 = vpop.f32.mrf.mxu1  ;;  %v608_v45 = vsel %vm364_vm2, %v607_v43, -inf }
 0x459   : > { %609 = vmax.xlane.f32.xlu1 %v608_v45 }
 0x45d   : > { %953 = vmax.xlane.f32.xlu1 %v952_v47 }
 0x4d2   : > { %v782_v48 = vpop.xlane.xlu0 %781 }
 0x4d3   : > { %v783_v49 = vsub.f32 %v779_v35, %v782_v48 }
 0x4d5   : > { %v784_v50 = vmul.f32 1.442695, %v783_v49 }
 0x4d7   : > { %1443 = vpow2.f32 %v784_v50 }
 0x4e2   : > { %v610_v51 = vpop.xlane.xlu1 %609 }
 0x4e3   : > { %v611_v59 = vsub.f32 %v607_v43, %v610_v51 }
 0x4e4   : > { %v1444_v52 = vpop.eup %1443 }
 0x4e5   : > { %v786_v53 = vsel %vm364_vm2, %v1444_v52, 0.0  ;;  %v612_v60 = vmul.f32 1.442695, %v611_v59 }
 0x4e6   : > { %787 = vadd.xlane.f32.xlu1 %v786_v53  ;;  %v954_v54 = vpop.xlane.xlu1 %953 }
 0x4e7   : > { %v955_v55 = vsub.f32 %v951_v46, %v954_v54 }
 0x4e9   : > { %v956_v56 = vmul.f32 1.442695, %v955_v55 }
 0x4eb   : > { %1445 = vpow2.f32 %v956_v56 }
 0x4ec   : > { %1447 = vpow2.f32 %v612_v60 }
 0x4f7   : > { %619 = vrot.lane.b32.xlu1 %v1805_v8, %s1620_s7  ;;  %s1132_s7 = scalar_lea.sflag [#allocation5], %s1775_s13 }
 0x4f8   : > { %v1446_v57 = vpop.eup %1445 }
 0x4f9   : > { %v958_v58 = vsel %vm364_vm2, %v1446_v57, 0.0  ;;  %v1448_v61 = vpop.eup %1447 }
 0x4fa   : > { %959 = vadd.xlane.f32.xlu0 %v958_v58  ;;  %v614_v62 = vsel %vm364_vm2, %v1448_v61, 0.0 }
 0x510   : > { %791 = vrot.lane.b32.xlu0 %v1805_v8, %s1621_s9  ;;  %s1535_s9 = scalar_lea.vmem %s1146_s30, 128 }
 0x511   : > { %p1536_p11 = scmp.ne.s32.totalorder %s1146_s30, %s1535_s9 }
 0x513   : > { %p1537_p1 = pnand %p1536_p11, %p1934_p0 }
 0x515   : > { %p1538_p2 = pneg %p1537_p1 }
 0x51b   : > { %615 = vadd.xlane.f32.xlu1 %v614_v62 }
 0x52c   : > { %963 = vrot.lane.b32.xlu1 %v1805_v8, %s1622_s16  ;;  %s1541_s16 = scalar_lea.vmem %s1540_s14, 256 }
 0x52d   : > { %p1543_p12 = scmp.lt.s32.totalorder %s1541_s16, %s1535_s9 }
 0x52f   : > { %p1544_p7 = por %p1543_p12, %p1542_p6 }
 0x531   : > { %p1545_p9 = pnand %p1544_p7, %p1538_p2 }
 0x56f   : > { %v788_v63 = vpop.xlane.xlu1 %787 }
 0x573   : > { %v620_v1 = vpop.permute.xlu1 %619 }
 0x574   : > { %1319 = vmatpush3.msra.mxu1 %v620_v1 }
 0x575   : > { %1328 = vmatprep.subr.mxu1 %v1610_v0 }
 0x583   : > { %v960_v3 = vpop.xlane.xlu0 %959 }
 0x587   : > { %v792_v7 = vpop.permute.xlu0 %791 }
 0x5a4   : > { %v616_v2 = vpop.xlane.xlu1 %615 }
 0x5a5   : > { %1449 = vrcp.f32 %v616_v2 }
 0x5a6   : > { %1451 = vrcp.f32 %v788_v63 }
 0x5a7   : > { %1453 = vrcp.f32 %v960_v3 }
 0x5a8   : > { %v964_v10 = vpop.permute.xlu1 %963 }
 0x5b2   : > { %v1450_v4 = vpop.eup %1449 }
 0x5b3   : > { %v618_v5 = vmul.f32 %v1450_v4, %v1448_v61  ;;  %v1452_v6 = vpop.eup %1451 }
 0x5b4   : > { %v790_v8 = vmul.f32 %v1452_v6, %v1444_v52  ;;  %v1454_v9 = vpop.eup %1453 }
 0x5b5   : > { %1321 = vmatmul.mubr.msk.f32.vlgmr.msra.gmra.mxu1 %vm364_vm2, %v618_v5  ;;  %v962_v11 = vmul.f32 %v1454_v9, %v1446_v57 }
 0x5b6   : > { %1329 = vmatpush3.msra.mxu1 %v792_v7  ;;  %1330 = vmatprep.mubr.msk.f32.mxu1 %vm1611_vm0, %v1610_v0 }
 0x5b7   : > { %1338 = vmatprep.subr.mxu1 %v1610_v0 }
 0x5b9   : > { %1331 = vmatmul.mubr.msk.f32.vlgmr.msra.gmra.mxu1 %vm364_vm2, %v790_v8 }
 0x5ba   : > { %1339 = vmatpush3.msra.mxu1 %v964_v10  ;;  %1340 = vmatprep.mubr.msk.f32.mxu1 %vm1611_vm0, %v1610_v0 }
 0x5bd   : > { %1341 = vmatmul.mubr.msk.f32.vlgmr.msra.gmra.mxu1 %vm364_vm2, %v962_v11 }
 0x675   : > { %v691_v15 = vpop.f32.mrf.mxu1 }
 0x676   : > { %696 = vrot.lane.b32.xlu1 %v691_v15, %s1623_s17 }
 0x677   : > { %v1322_v17 = vpop.f32.mrf.mxu1 }
 0x679   : > { %v863_v18 = vpop.f32.mrf.mxu1 }
 0x67a   : > { %868 = vrot.lane.b32.xlu0 %v863_v18, %s1624_s24 }
 0x67b   : > { %v1332_v19 = vpop.f32.mrf.mxu1 }
 0x67d   : > { %v1035_v20 = vpop.f32.mrf.mxu1 }
 0x67e   : > { %1040 = vrot.lane.b32.xlu1 %v1035_v20, %s1625_s26 }
 0x67f   : > { %v1342_v21 = vpop.f32.mrf.mxu1 }
 0x6e8   : > { %v697_v22 = vpop.permute.xlu1 %696 }
 0x6e9   : > { %700 = vst.msk [vmem:[#allocation2] sm:$0xff] %vm699_vm4, %v697_v22 }
 0x6ec   : > { %v869_v23 = vpop.permute.xlu0 %868 }
 0x6ed   : > { %872 = vst.msk [vmem:[#allocation2] sm:$0xff] %vm871_vm5, %v869_v23 }
 0x6f0   : > { %v1041_v0 = vpop.permute.xlu1 %1040 }
 0x6f1   : > { %1044 = vst.msk [vmem:[#allocation2] sm:$0xff] %vm1043_vm6, %v1041_v0 }
 0x6f8   : > { %v1045_v24 = vld [vmem:[#allocation2] sm:$0xff] }
 0x6f9   : > { %1352 = vmatmul.mubr.msk.f32.vlgmr.msra.gmra.mxu0 %vm281_vm1, %v1045_v24 }
 0x7b9   : > { %v1126_v26 = vpop.f32.mrf.mxu0 }
 0x7ba   : > { %v1127_v27 = vadd.f32 %v1260_v25, %v1126_v26 }
 0x7bb   : > { %v1353_v28 = vpop.f32.mrf.mxu0 }
 0x7bc   : > { %1130 = vst.msk [vmem:[%s268_s12] sm:$0xff] %vm281_vm1, %v1127_v27 }
 0x7bd   : > { %1548 = shalt.err (!%p1545_p9)
}
 0x7be   : > { %s1549_s17 = scalar_lea.hbm %s1875_s28, 128  ;;  %s1553_s26 = scalar_lea.hbm %s1918_s5, 256 }
 0x7bf   : > { %p1550_p13 = scmp.ne.s32.totalorder %s1875_s28, %s1549_s17  ;;  %p1554_p4 = scmp.lt.s32.totalorder %s1875_s28, %s1918_s5 }
 0x7c0   : > { %p1555_p8 = scmp.lt.s32.totalorder %s1553_s26, %s1549_s17 }
 0x7c1   : > { %p1551_p5 = pnand %p1550_p13, %p1934_p0 }
 0x7c2   : > { %p1556_p3 = por %p1555_p8, %p1554_p4 }
 0x7c3   : > { %p1552_p10 = pneg %p1551_p5 }
 0x7c5   : > { %p1557_p11 = pnand %p1556_p3, %p1552_p10 }
 0x7c7   : > { %1560 = shalt.err (!%p1557_p11)
}
 0x7c8   : > { %1364 = dma.vmem_to_hbm [thread:$0]  (%p1934_p0), %s1146_s30, 128, %s1875_s28, %s1132_s7  }
 0x7c9 PF: > { %s1157_s11 = sand.u32 1, %s1591_s18   ;;  %p1935_p1 = scmp.ne.s32.totalorder %s1924_s25, 0 }
 0x7ca   : > { %p1936_p2 = scmp.ge.s32.totalorder %s1603_s21, 2  ;;  %s1158_s12 = scalar_lea.sflag [#allocation5], %s1157_s11 }
 0x7cc   : > { %p1378_p6 = pnand %p1936_p2, %p1935_p1 }
 0x7ce   : > { %p1379_p12 = pneg %p1378_p6 }
 0x7d0   : > { %1586 = dma.done.wait (%p1379_p12), %s1158_s12, 128  }
 0x7d1   : > { %1588 = vsyncadd (%p1379_p12), %s1158_s12, 4294967168  ;;  %p19_p7 = scmp.ge.s32.totalorder %s1729_s15, 4   ;;  %s1937_s18 = smov %s1595_s19 }
 0x7d2   : > { %s1938_s19 = smov %s1599_s20  ;;  %s1939_s20 = smov %s1745_s27 }
 0x7d3   : > { %s1940_s21 = smov %s1729_s15  ;;  %21 = sbr.rel (!%p19_p7) target bundleno = 6 (0x6), region = 93 }
 0x7d8   :  { %1163 = vsyncpa [#allocation4], 1 }
 0x7d9   :  { %1165 = vsyncpa [#allocation4 + $0x1], 1 }
 0x7da   :  { %1166 = vsyncpa [#allocation7], 1 }
 0x7db   :  { %1167 = vsyncpa [#allocation5], 1 }
 0x7dc   :  { %1169 = vsyncpa [#allocation5 + $0x1], 1 }

</bundles_post_ra>
